<compile_context>
chip_gen: v7x
topology: tpu7x:2x2x1
jax: 0.10.0
libtpu: 0.0.40
codegen_flags: <defaults>
</compile_context>

<pallas_src>
import jax
import jax.numpy as jnp
from jax.experimental import pallas as pl
from jax.experimental.pallas import tpu as pltpu

LANE = 128        # MXU / lane width; hidden and output feature dims are padded to this
IN_PAD = 16       # state features padded to one bf16 sublane pack (16 rows per vreg)
N_LAYERS = 3
MAX_TILE_B = 8192 # VMEM-safe cap on the batch tile (well under v7x 32 MiB scoped default)


def _round_up(x, m):
    return (x + m - 1) // m * m


def lander_mlp_kernel(x_ref, w_ref, b_ref, o_ref):
    """Fused 3-layer MLP on one (tile_b, IN_PAD) batch tile.

    x_ref: (tile_b, 16)      bf16  state, zero-padded to 16 lanes (natural-width stream)
    w_ref: (3, 128, 128)     bf16  per-layer (in, out) weights, zero-padded, VMEM-resident
    b_ref: (3, 1, 128)       f32   per-layer biases, zero-padded, VMEM-resident
    o_ref: (tile_b, out_pad) f32   narrow output (cols >= action_size are zero-ish/ignored)
    """
    # Layer 1: (tile_b,16) @ (16,128).  Static sublane-aligned slice of the weight stack;
    # MXU matmul with f32 accumulation, bias + ReLU stay f32 on the VPU (v5e fast path).
    h = jnp.dot(x_ref[...], w_ref[0, :IN_PAD, :],
                preferred_element_type=jnp.float32) + b_ref[0]
    h = jnp.maximum(h, 0.0)
    # Layer 2: cast to bf16 only at the MXU input (bf16 fast path on v6e/v7x).
    h = jnp.dot(h.astype(jnp.bfloat16), w_ref[1],
                preferred_element_type=jnp.float32) + b_ref[1]
    h = jnp.maximum(h, 0.0)
    # Layer 3 (no activation), then narrow lane slice for the compact output store.
    y = jnp.dot(h.astype(jnp.bfloat16), w_ref[2],
                preferred_element_type=jnp.float32) + b_ref[2]
    o_ref[...] = y[:, : o_ref.shape[-1]]


def lander_network_forward(state, params, *, block_b=2048, min_grid=1):
    """state: (B, state_size) float array. Returns (B, action_size) f32 Q-values.

    block_b:   max rows per grid step (rounded to a multiple of 16, capped at 8192).
    min_grid:  set to 2 on v7x megacore so both TensorCores get a batch tile; leave 1
               on v5e/v6e (single TensorCore) to avoid an extra grid step.
    """
    W, b = params["W"], params["b"]
    state_size = params["state_size"]
    action_size = params["action_size"]
    out_pad = max(8, _round_up(action_size, 8))   # narrow lane-dim via full-array escape
    B = state.shape[0]

    # Batch tiling: multiples of 16 (bf16 sublane packing); large tiles -> 1-2 grid steps.
    B16 = _round_up(max(B, 1), 16)
    tile_b = min(_round_up(block_b, 16), B16, MAX_TILE_B)
    if min_grid > 1:
        tile_b = min(tile_b, _round_up(pl.cdiv(B16, min_grid), 16))
    B_pad = _round_up(B16, tile_b)
    grid = (B_pad // tile_b,)

    # Host-side prep: natural-width bf16 input (no 128-lane slab, no extra pad pass).
    x = jnp.zeros((B_pad, IN_PAD), jnp.bfloat16)
    x = x.at[:B, :state_size].set(state.astype(jnp.bfloat16))

    flops = 2 * B_pad * (IN_PAD * LANE + LANE * LANE + LANE * LANE)
    bytes_accessed = x.size * 2 + W.size * 2 + b.size * 4 + B_pad * out_pad * 4

    out_padded = pl.pallas_call(
        lander_mlp_kernel,
        out_shape=jax.ShapeDtypeStruct((B_pad, out_pad), jnp.float32),
        grid=grid,
        in_specs=[
            # Activation stream: tiled along batch, pipelined/double-buffered.
            pl.BlockSpec((tile_b, IN_PAD), lambda i: (i, 0)),
            # Weight stack: constant index_map -> DMA'd once, resident in VMEM.
            pl.BlockSpec((N_LAYERS, LANE, LANE), lambda i: (0, 0, 0)),
            # Bias stack: resident in VMEM.
            pl.BlockSpec((N_LAYERS, 1, LANE), lambda i: (0, 0, 0)),
        ],
        out_specs=pl.BlockSpec((tile_b, out_pad), lambda i: (i, 0)),
        compiler_params=pltpu.CompilerParams(
            # Batch tiles are independent -> shard the grid across TCs on v7x megacore.
            dimension_semantics=("parallel",),
        ),
        cost_estimate=pl.CostEstimate(
            flops=int(flops), transcendentals=0, bytes_accessed=int(bytes_accessed)),
    )(x, W, b)

    # Strip batch padding and the (small) lane padding outside the kernel.
    return out_padded[:B, :action_size]


def init_params(key, state_size, action_size, fc1_units=64, fc2_units=64):
    """PyTorch nn.Linear-style init (U(-1/sqrt(fan_in), +1/sqrt(fan_in))), packed into
    zero-padded (3,128,128)/(3,1,128) stacks.  Weights stored (in, out) so the kernel
    computes x @ W + b (== x @ W_pt.T + b for an nn.Linear weight of shape (out, in))."""
    assert max(state_size, fc1_units, fc2_units, action_size) <= LANE
    assert state_size <= IN_PAD
    ks = jax.random.split(key, 2 * N_LAYERS)
    dims = [(state_size, fc1_units), (fc1_units, fc2_units), (fc2_units, action_size)]

    W = jnp.zeros((N_LAYERS, LANE, LANE), jnp.float32)
    b = jnp.zeros((N_LAYERS, 1, LANE), jnp.float32)
    for l, (fan_in, fan_out) in enumerate(dims):
        bound = fan_in ** -0.5
        wl = jax.random.uniform(ks[2 * l], (fan_in, fan_out), jnp.float32, -bound, bound)
        bl = jax.random.uniform(ks[2 * l + 1], (fan_out,), jnp.float32, -bound, bound)
        W = W.at[l, :fan_in, :fan_out].set(wl)
        b = b.at[l, 0, :fan_out].set(bl)

    return {
        "W": W.astype(jnp.bfloat16),   # bf16 MXU inputs, f32 accumulation in-kernel
        "b": b,                        # biases stay f32
        "state_size": state_size,
        "action_size": action_size,
    }


def reference_forward(state, params):
    """Pure-jnp reference mirroring the kernel's dtype flow (bf16 dots, f32 accumulate)."""
    W, b = params["W"], params["b"]
    s = params["state_size"]
    B = state.shape[0]
    x = jnp.zeros((B, IN_PAD), jnp.bfloat16).at[:, :s].set(state.astype(jnp.bfloat16))
    h = jnp.maximum(
        jnp.dot(x, W[0, :IN_PAD, :], preferred_element_type=jnp.float32) + b[0], 0.0)
    h = jnp.maximum(
        jnp.dot(h.astype(jnp.bfloat16), W[1], preferred_element_type=jnp.float32) + b[1], 0.0)
    o = jnp.dot(h.astype(jnp.bfloat16), W[2], preferred_element_type=jnp.float32) + b[2]
    return o[:, : params["action_size"]]


if __name__ == "__main__":
    key = jax.random.PRNGKey(0)
    k_params, k_state = jax.random.split(key)

    batch = 200          # not a multiple of 16 on purpose: exercises batch padding
    state_size = 8       # LunarLander-v2 observation dim
    action_size = 4      # LunarLander-v2 action dim

    params = init_params(k_params, state_size, action_size, fc1_units=64, fc2_units=64)
    state = jax.random.normal(k_state, (batch, state_size), jnp.float32)

    ref = reference_forward(state, params)

    # Default path: one large batch tile -> single grid step (v5e/v6e ideal).
    out = jax.block_until_ready(lander_network_forward(state, params))
    assert out.shape == (batch, action_size)
    assert jnp.allclose(out, ref, atol=1e-3, rtol=1e-3), "mismatch vs reference (grid=1)"

    # Two-step "parallel" grid (what you'd request on v7x megacore).
    out2 = jax.block_until_ready(lander_network_forward(state, params, min_grid=2))
    assert out2.shape == (batch, action_size)
    assert jnp.allclose(out2, ref, atol=1e-3, rtol=1e-3), "mismatch vs reference (grid=2)"

    print("KERNEL_OK")
</pallas_src>

<mosaic_0001>
module attributes {stable_mosaic.version = 11 : i64} {
  func.func @lander_mlp_kernel(%arg0: i32, %arg1: memref<208x16xbf16, #tpu.memory_space<vmem>>, %arg2: memref<3x128x128xbf16, #tpu.memory_space<vmem>>, %arg3: memref<3x1x128xf32, #tpu.memory_space<vmem>>, %arg4: memref<208x8xf32, #tpu.memory_space<vmem>>) attributes {dimension_semantics = [#tpu.dimension_semantics<parallel>], iteration_bounds = array<i64: 1>, scalar_prefetch = 0 : i64, scratch_operands = 0 : i64, tpu.core_type = #tpu.core_type<tc>, window_params = [{transform_indices = @transform_0, window_bounds = array<i64: 208, 16>}, {pipeline_mode = #tpu.pipeline_mode<synchronous>, transform_indices = @transform_1, window_bounds = array<i64: 3, 128, 128>}, {pipeline_mode = #tpu.pipeline_mode<synchronous>, transform_indices = @transform_2, window_bounds = array<i64: 3, 1, 128>}, {transform_indices = @transform_3, window_bounds = array<i64: 208, 8>}]} {
    %c0 = arith.constant 0 : index
    %c0_0 = arith.constant 0 : index
    %0 = vector.load %arg1[%c0, %c0_0] : memref<208x16xbf16, #tpu.memory_space<vmem>>, vector<208x16xbf16>
    %c0_1 = arith.constant 0 : index
    %c0_2 = arith.constant 0 : index
    %c0_3 = arith.constant 0 : index
    %1 = vector.load %arg2[%c0_1, %c0_2, %c0_3] : memref<3x128x128xbf16, #tpu.memory_space<vmem>>, vector<1x16x128xbf16>
    %2 = vector.shape_cast %1 : vector<1x16x128xbf16> to vector<16x128xbf16>
    %cst = arith.constant dense<0.000000e+00> : vector<208x128xf32>
    %3 = tpu.matmul %0, %2, %cst {dimension_numbers = #tpu.dot_dimension_numbers<[1], [0], [0], [1], [0, 0, 1, 1], [], []>} : vector<208x16xbf16>, vector<16x128xbf16>, vector<208x128xf32> -> vector<208x128xf32>
    %c0_4 = arith.constant 0 : index
    %c0_5 = arith.constant 0 : index
    %c0_6 = arith.constant 0 : index
    %4 = vector.load %arg3[%c0_4, %c0_5, %c0_6] : memref<3x1x128xf32, #tpu.memory_space<vmem>>, vector<1x1x128xf32>
    %5 = vector.shape_cast %4 : vector<1x1x128xf32> to vector<1x128xf32>
    %6 = vector.broadcast %5 : vector<1x128xf32> to vector<208x128xf32>
    %7 = arith.addf %3, %6 : vector<208x128xf32>
    %cst_7 = arith.constant 0.000000e+00 : f32
    %8 = vector.broadcast %cst_7 : f32 to vector<208x128xf32>
    %9 = arith.maximumf %7, %8 : vector<208x128xf32>
    %10 = arith.truncf %9 : vector<208x128xf32> to vector<208x128xbf16>
    %c1 = arith.constant 1 : index
    %c0_8 = arith.constant 0 : index
    %c0_9 = arith.constant 0 : index
    %11 = vector.load %arg2[%c1, %c0_8, %c0_9] : memref<3x128x128xbf16, #tpu.memory_space<vmem>>, vector<1x128x128xbf16>
    %12 = vector.shape_cast %11 : vector<1x128x128xbf16> to vector<128x128xbf16>
    %cst_10 = arith.constant dense<0.000000e+00> : vector<208x128xf32>
    %13 = tpu.matmul %10, %12, %cst_10 {dimension_numbers = #tpu.dot_dimension_numbers<[1], [0], [0], [1], [0, 0, 1, 1], [], []>} : vector<208x128xbf16>, vector<128x128xbf16>, vector<208x128xf32> -> vector<208x128xf32>
    %c1_11 = arith.constant 1 : index
    %c0_12 = arith.constant 0 : index
    %c0_13 = arith.constant 0 : index
    %14 = vector.load %arg3[%c1_11, %c0_12, %c0_13] : memref<3x1x128xf32, #tpu.memory_space<vmem>>, vector<1x1x128xf32>
    %15 = vector.shape_cast %14 : vector<1x1x128xf32> to vector<1x128xf32>
    %16 = vector.broadcast %15 : vector<1x128xf32> to vector<208x128xf32>
    %17 = arith.addf %13, %16 : vector<208x128xf32>
    %cst_14 = arith.constant 0.000000e+00 : f32
    %18 = vector.broadcast %cst_14 : f32 to vector<208x128xf32>
    %19 = arith.maximumf %17, %18 : vector<208x128xf32>
    %20 = arith.truncf %19 : vector<208x128xf32> to vector<208x128xbf16>
    %c2 = arith.constant 2 : index
    %c0_15 = arith.constant 0 : index
    %c0_16 = arith.constant 0 : index
    %21 = vector.load %arg2[%c2, %c0_15, %c0_16] : memref<3x128x128xbf16, #tpu.memory_space<vmem>>, vector<1x128x128xbf16>
    %22 = vector.shape_cast %21 : vector<1x128x128xbf16> to vector<128x128xbf16>
    %cst_17 = arith.constant dense<0.000000e+00> : vector<208x128xf32>
    %23 = tpu.matmul %20, %22, %cst_17 {dimension_numbers = #tpu.dot_dimension_numbers<[1], [0], [0], [1], [0, 0, 1, 1], [], []>} : vector<208x128xbf16>, vector<128x128xbf16>, vector<208x128xf32> -> vector<208x128xf32>
    %c2_18 = arith.constant 2 : index
    %c0_19 = arith.constant 0 : index
    %c0_20 = arith.constant 0 : index
    %24 = vector.load %arg3[%c2_18, %c0_19, %c0_20] : memref<3x1x128xf32, #tpu.memory_space<vmem>>, vector<1x1x128xf32>
    %25 = vector.shape_cast %24 : vector<1x1x128xf32> to vector<1x128xf32>
    %26 = vector.broadcast %25 : vector<1x128xf32> to vector<208x128xf32>
    %27 = arith.addf %23, %26 : vector<208x128xf32>
    %28 = vector.extract_strided_slice %27 {offsets = [0, 0], sizes = [208, 8], strides = [1, 1]} : vector<208x128xf32> to vector<208x8xf32>
    %c0_21 = arith.constant 0 : index
    %c0_22 = arith.constant 0 : index
    %29 = vector.load %arg4[%c0_21, %c0_22] : memref<208x8xf32, #tpu.memory_space<vmem>>, vector<208x8xf32>
    tpu.vector_store %arg4[%c0_21, %c0_22], %28 {strides = array<i32>} : memref<208x8xf32, #tpu.memory_space<vmem>>, vector<208x8xf32>,
    return
  }
  func.func @transform_0(%arg0: i32) -> (i32, i32) {
    %c0_i32 = arith.constant 0 : i32
    %c0_i32_0 = arith.constant 0 : i32
    return %arg0, %c0_i32 : i32, i32
  }
  func.func @transform_1(%arg0: i32) -> (i32, i32, i32) {
    %c0_i32 = arith.constant 0 : i32
    %c0_i32_0 = arith.constant 0 : i32
    %c0_i32_1 = arith.constant 0 : i32
    %c0_i32_2 = arith.constant 0 : i32
    return %c0_i32, %c0_i32_0, %c0_i32_1 : i32, i32, i32
  }
  func.func @transform_2(%arg0: i32) -> (i32, i32, i32) {
    %c0_i32 = arith.constant 0 : i32
    %c0_i32_0 = arith.constant 0 : i32
    %c0_i32_1 = arith.constant 0 : i32
    %c0_i32_2 = arith.constant 0 : i32
    return %c0_i32, %c0_i32_0, %c0_i32_1 : i32, i32, i32
  }
  func.func @transform_3(%arg0: i32) -> (i32, i32) {
    %c0_i32 = arith.constant 0 : i32
    %c0_i32_0 = arith.constant 0 : i32
    return %arg0, %c0_i32 : i32, i32
  }
}

</mosaic_0001>

<bundles_post_ra>
// kernel: tpu_custom_call.1
= control target key start
LH: loop header
LB: loop body
LE: loop exit
PB: predicated region body
PF: predicated region fallthrough
CT: control target
= control target key end

     0   :  { %8 = vsyncpa [#allocation3], 0  ;;  %s1197_s12 = smov [#allocation2]   ;;  %s1588_s0 = inlined_call_operand.vmem [shape: bf16[208,16], index: 0, kind: input, shape index: {}]   ;;  %s1589_s1 = inlined_call_operand.hbm [shape: bf16[3,128,128], index: 1, kind: input, shape index: {}]   ;;  %s1590_s2 = inlined_call_operand.vmem [shape: f32[3,1,128], index: 2, kind: input, shape index: {}]   ;;  %s1591_s3 = inlined_call_operand.vmem [shape: f32[208,8], index: 3, kind: output, shape index: {}]  }
   0x1   :  { %s16_s13 = sshll.u32 %s1197_s12, 4  ;;  %s1173_s16 = scalar_lea.hbm %s1589_s1, 3072  ;;  %s17_s13 = int_to_ptr.vmem [resolvable:$true] %s16_s13 }
   0x2   :  { %p1174_p0 = scmp.ne.s32.totalorder %s1589_s1, %s1173_s16  ;;  %p1177_p1 = scmp.lt.u32.totalorder %s1173_s16, %s1589_s1 }
   0x4   :  { %p1179_p2 = pnand %p1177_p1, %p1174_p0 }
   0x6   :  { %1182 = shalt.err (!%p1179_p2)
}
   0x7   :  { %s1183_s21 = scalar_lea.vmem %s17_s13, 3072  ;;  %p1188_p4 = scmp.lt.s32.totalorder %s17_s13, %s17_s13 }
   0x8   :  { %p1184_p3 = scmp.ne.s32.totalorder %s17_s13, %s1183_s21  ;;  %p1189_p5 = scmp.lt.s32.totalorder %s1183_s21, %s1183_s21 }
   0xa   :  { %p1190_p6 = por %p1189_p5, %p1188_p4 }
   0xc   :  { %p1191_p7 = pnand %p1190_p6, %p1184_p3 }
   0xe   :  { %1194 = shalt.err (!%p1191_p7)
}
   0xf   :  { %s1198_s22 = smov 64   ;;  %s1199_s23 = smov 4  }
  0x10   :  { %22 = dma.hbm_to_vmem [thread:$0]  %s1589_s1, 3072, %s17_s13, [#allocation3], %s1198_s22, %s1198_s22, %s1199_s23  }
  0x11   :  { %1195 = dma.done.wait [#allocation3], 3072  }
  0x12   :  { %1196 = vsyncadd [#allocation3], 4294964224  ;;  %v1200_v0 = vmov 0.0   ;;  %vm1201_vm0 = vmmov 0   ;;  %v1143_v1 = vld [vmem:[#allocation2] sm:$0xff]   ;;  %vm135_vm1 = vcmask 130048  }
  0x13   :  { %946 = vmatprep.subr.bf16.mxu0 %v1200_v0  ;;  %948 = vmatprep.mubr.msk.bf16.mxu0 %vm1201_vm0, %v1200_v0  ;;  %v1144_v2 = vld [vmem:[%s1588_s0] sm:$0xff]   ;;  %v1151_v3 = vld [vmem:[%s1588_s0 + $0x38] sm:$0xff]   ;;  %v1145_v4 = vld [vmem:[%s1588_s0 + $0x8] sm:$0xff]   ;;  %vm810_vm2 = vcmask 64512  }
  0x14   :  { %1136 = vmatprep.subr.bf16.mxu1 %v1200_v0  ;;  %976 = vmatprep.mubr.msk.bf16.mxu1 %vm1201_vm0, %v1200_v0  ;;  %v1152_v5 = vld [vmem:[%s1588_s0 + $0x40] sm:$0xff]   ;;  %v1158_v7 = vld [vmem:[#allocation2 + $0x48] sm:$0xff]   ;;  %v1146_v8 = vld [vmem:[%s1588_s0 + $0x10] sm:$0xff]  }
  0x15   :  { %947 = vmatpush3.bf16.msra.mxu0 %v1143_v1  ;;  %1137 = vmatpush3.bf16.msra.mxu1 %v1143_v1  ;;  %v1157_v6 = vld [vmem:[#allocation2 + $0x40] sm:$0xff]   ;;  %v1159_v9 = vld [vmem:[#allocation2 + $0x50] sm:$0xff]   ;;  %v1153_v10 = vld [vmem:[%s1588_s0 + $0x48] sm:$0xff]  }
  0x16   :  { %1000 = vmatprep.subr.bf16.mxu1 %v1200_v0  ;;  %1068 = vmatprep.subr.bf16.mxu0 %v1200_v0  ;;  %v1160_v11 = vld [vmem:[#allocation2 + $0x58] sm:$0xff]   ;;  %v1161_v13 = vld [vmem:[#allocation2 + $0x60] sm:$0xff]   ;;  %v1154_v14 = vld [vmem:[%s1588_s0 + $0x50] sm:$0xff]  }
  0x17   :  { %v1147_v12 = vld [vmem:[%s1588_s0 + $0x18] sm:$0xff]   ;;  %v1162_v15 = vld [vmem:[#allocation2 + $0x68] sm:$0xff]   ;;  %v1148_v16 = vld [vmem:[%s1588_s0 + $0x20] sm:$0xff]  }
  0x18   :  { %949 = vmatmul.mubr.msk.bf16.vlgmr.msra.gmra.mrb[0].mxu0 %vm135_vm1, %v1144_v2  ;;  %977 = vmatmul.mubr.msk.bf16.vlgmr.msra.gmra.mrb[0].mxu1 %vm135_vm1, %v1151_v3  ;;  %v1163_v17 = vld [vmem:[#allocation2 + $0x70] sm:$0xff]   ;;  %v1155_v18 = vld [vmem:[%s1588_s0 + $0x58] sm:$0xff]   ;;  %v1149_v19 = vld [vmem:[%s1588_s0 + $0x28] sm:$0xff]  }
  0x19   :  { %952 = vmatprep.mubr.msk.bf16.mxu0 %vm1201_vm0, %v1200_v0  ;;  %980 = vmatprep.mubr.msk.bf16.mxu1 %vm1201_vm0, %v1200_v0  ;;  %v1156_v20 = vld [vmem:[%s1588_s0 + $0x60] sm:$0xff]   ;;  %v1150_v21 = vld [vmem:[%s1588_s0 + $0x30] sm:$0xff]   ;;  %v1164_v22 = vld [vmem:[#allocation2 + $0x78] sm:$0xff]  }
  0x1a   :  { %1001 = vmatpush3.bf16.msra.mxu1 %v1157_v6  ;;  %v1165_v23 = vld [vmem:[#allocation2 + $0x80] sm:$0xff]   ;;  %v1166_v24 = vld [vmem:[#allocation2 + $0x88] sm:$0xff]   ;;  %v1167_v25 = vld [vmem:[#allocation2 + $0x90] sm:$0xff]  }
  0x1b   :  { %1002 = vmatprep.subr.bf16.mxu1 %v1200_v0  ;;  %1069 = vmatpush3.bf16.msra.mxu0 %v1165_v23  ;;  %v1168_v26 = vld [vmem:[#allocation2 + $0x98] sm:$0xff]   ;;  %v1169_v27 = vld [vmem:[#allocation2 + $0xa0] sm:$0xff]   ;;  %v1170_v28 = vld [vmem:[#allocation2 + $0xa8] sm:$0xff]  }
  0x1c   :  { %1070 = vmatprep.subr.bf16.mxu0 %v1200_v0  ;;  %v1335_v29 = vld [vmem:[%s1590_s2] ss:$0 sm:$0xff]  ;;  %v1171_v30 = vld [vmem:[#allocation2 + $0xb0] sm:$0xff]  }
  0x1e   :  { %1003 = vmatpush3.bf16.msra.mxu1 %v1158_v7 }
  0x1f   :  { %1004 = vmatprep.subr.bf16.mxu1 %v1200_v0  ;;  %1071 = vmatpush3.bf16.msra.mxu0 %v1166_v24 }
  0x20   :  { %953 = vmatmul.mubr.msk.bf16.gmra.mrb[4].mxu0 %vm135_vm1, %v1145_v4  ;;  %981 = vmatmul.mubr.msk.bf16.gmra.mrb[4].mxu1 %vm135_vm1, %v1152_v5 }
  0x21   :  { %956 = vmatprep.mubr.msk.bf16.mxu0 %vm1201_vm0, %v1200_v0  ;;  %984 = vmatprep.mubr.msk.bf16.mxu1 %vm1201_vm0, %v1200_v0 }
  0x22   :  { %1005 = vmatpush3.bf16.msra.mxu1 %v1159_v9  ;;  %1072 = vmatprep.subr.bf16.mxu0 %v1200_v0 }
  0x23   :  { %1006 = vmatprep.subr.bf16.mxu1 %v1200_v0  ;;  %1073 = vmatpush3.bf16.msra.mxu0 %v1167_v25 }
  0x24   :  { %1074 = vmatprep.subr.bf16.mxu0 %v1200_v0 }
  0x26   :  { %1007 = vmatpush3.bf16.msra.mxu1 %v1160_v11 }
  0x27   :  { %1008 = vmatprep.subr.bf16.mxu1 %v1200_v0  ;;  %1075 = vmatpush3.bf16.msra.mxu0 %v1168_v26 }
  0x28   :  { %957 = vmatmul.mubr.msk.bf16.gmra.mrb[8].mxu0 %vm135_vm1, %v1146_v8  ;;  %985 = vmatmul.mubr.msk.bf16.gmra.mrb[8].mxu1 %vm135_vm1, %v1153_v10 }
  0x29   :  { %960 = vmatprep.mubr.msk.bf16.mxu0 %vm1201_vm0, %v1200_v0  ;;  %988 = vmatprep.mubr.msk.bf16.mxu1 %vm1201_vm0, %v1200_v0 }
  0x2a   :  { %1009 = vmatpush3.bf16.msra.mxu1 %v1161_v13  ;;  %1076 = vmatprep.subr.bf16.mxu0 %v1200_v0 }
  0x2b   :  { %1010 = vmatprep.subr.bf16.mxu1 %v1200_v0  ;;  %1077 = vmatpush3.bf16.msra.mxu0 %v1169_v27 }
  0x2c   :  { %1078 = vmatprep.subr.bf16.mxu0 %v1200_v0 }
  0x2e   :  { %1011 = vmatpush3.bf16.msra.mxu1 %v1162_v15 }
  0x2f   :  { %1012 = vmatprep.subr.bf16.mxu1 %v1200_v0  ;;  %1079 = vmatpush3.bf16.msra.mxu0 %v1170_v28 }
  0x30   :  { %961 = vmatmul.mubr.msk.bf16.gmra.mrb[12].mxu0 %vm135_vm1, %v1147_v12  ;;  %989 = vmatmul.mubr.msk.bf16.gmra.mrb[12].mxu1 %vm135_vm1, %v1154_v14 }
  0x31   :  { %964 = vmatprep.mubr.msk.bf16.mxu0 %vm1201_vm0, %v1200_v0  ;;  %992 = vmatprep.mubr.msk.bf16.mxu1 %vm1201_vm0, %v1200_v0 }
  0x32   :  { %1013 = vmatpush3.bf16.msra.mxu1 %v1163_v17  ;;  %1080 = vmatprep.subr.bf16.mxu0 %v1200_v0 }
  0x33   :  { %1014 = vmatprep.subr.bf16.mxu1 %v1200_v0  ;;  %1081 = vmatpush3.bf16.msra.mxu0 %v1171_v30 }
  0x34   :  { %1082 = vmatprep.subr.bf16.mxu0 %v1200_v0 }
  0x36   :  { %1015 = vmatpush3.bf16.msra.mxu1 %v1164_v22 }
  0x38   :  { %965 = vmatmul.mubr.msk.bf16.gmra.mrb[16].mxu0 %vm135_vm1, %v1148_v16  ;;  %993 = vmatmul.mubr.msk.bf16.gmra.mrb[16].mxu1 %vm135_vm1, %v1155_v18 }
  0x39   :  { %968 = vmatprep.mubr.msk.bf16.mxu0 %vm1201_vm0, %v1200_v0  ;;  %996 = vmatprep.mubr.msk.bf16.mxu1 %vm1201_vm0, %v1200_v0 }
  0x40   :  { %969 = vmatmul.mubr.msk.bf16.gmra.mrb[20].mxu0 %vm135_vm1, %v1149_v19  ;;  %997 = vmatmul.mubr.msk.bf16.gmra.mrb[20].mxu1 %vm135_vm1, %v1156_v20 }
  0x41   :  { %972 = vmatprep.mubr.msk.bf16.mxu0 %vm1201_vm0, %v1200_v0  ;;  %1016 = vmatprep.mubr.msk.bf16.mxu1 %vm1201_vm0, %v1200_v0 }
  0x48   :  { %973 = vmatmul.mubr.msk.bf16.gmra.mrb[24].mxu0 %vm135_vm1, %v1150_v21 }
  0x49   :  { %1084 = vmatprep.mubr.msk.bf16.mxu0 %vm1201_vm0, %v1200_v0 }
  0xeb   :  { %v209_v31 = vpop.f32.mrb[0].mxu0  ;;  %v265_v39 = vpop.f32.mrb[0].mxu1 }
  0xec   :  { %v210_v32 = vadd.f32 %v1335_v29, %v209_v31  ;;  %v950_v33 = vpop.f32.mrb[1].mxu0  ;;  %v266_v40 = vadd.f32 %v1335_v29, %v265_v39  ;;  %v978_v41 = vpop.f32.mrb[1].mxu1 }
  0xed   :  { %v212_v34 = vpop.f32.mrb[2].mxu0  ;;  %v268_v43 = vpop.f32.mrb[2].mxu1 }
  0xee   :  { %v213_v35 = vadd.f32 %v1335_v29, %v212_v34  ;;  %v951_v36 = vpop.f32.mrb[3].mxu0  ;;  %v312_v37 = vmax.f32 %v210_v32, 0.0  ;;  %v326_v45 = vmax.f32 %v266_v40, 0.0  ;;  %v269_v46 = vadd.f32 %v1335_v29, %v268_v43  ;;  %v979_v47 = vpop.f32.mrb[3].mxu1 }
  0xf0   :  { %v313_v38 = vmax.f32 %v213_v35, 0.0  ;;  %v327_v51 = vmax.f32 %v269_v46, 0.0 }
  0xf2   :  { %v338_v42 = vpack.c.bf16 %v313_v38, %v312_v37  ;;  %v1347_v54 = vpack.c.bf16 %v327_v51, %v326_v45 }
  0xf3   :  { %v217_v44 = vpop.f32.mrb[4].mxu0  ;;  %v273_v57 = vpop.f32.mrb[4].mxu1 }
  0xf4   :  { %v218_v48 = vadd.f32 %v1335_v29, %v217_v44  ;;  %v954_v49 = vpop.f32.mrb[5].mxu0  ;;  %1017 = vmatmul.mubr.bf16.vlgmr.msra.gmra.mrb[24].mxu1 %v338_v42  ;;  %v274_v58 = vadd.f32 %v1335_v29, %v273_v57  ;;  %v982_v59 = vpop.f32.mrb[5].mxu1 }
  0xf5   :  { %v220_v50 = vpop.f32.mrb[6].mxu0  ;;  %1020 = vmatprep.mubr.msk.bf16.mxu1 %vm1201_vm0, %v1200_v0  ;;  %v276_v61 = vpop.f32.mrb[6].mxu1 }
  0xf6   :  { %v221_v52 = vadd.f32 %v1335_v29, %v220_v50  ;;  %v955_v53 = vpop.f32.mrb[7].mxu0  ;;  %v314_v55 = vmax.f32 %v218_v48, 0.0  ;;  %v328_v63 = vmax.f32 %v274_v58, 0.0  ;;  %v277_v1 = vadd.f32 %v1335_v29, %v276_v61  ;;  %v983_v2 = vpop.f32.mrb[7].mxu1 }
  0xf8   :  { %v315_v56 = vmax.f32 %v221_v52, 0.0  ;;  %v329_v6 = vmax.f32 %v277_v1, 0.0 }
  0xfa   :  { %v339_v60 = vpack.c.bf16 %v315_v56, %v314_v55  ;;  %v1355_v9 = vpack.c.bf16 %v329_v6, %v328_v63 }
  0xfb   :  { %v225_v62 = vpop.f32.mrb[8].mxu0  ;;  %v281_v12 = vpop.f32.mrb[8].mxu1 }
  0xfc   :  { %v226_v3 = vadd.f32 %v1335_v29, %v225_v62  ;;  %v958_v4 = vpop.f32.mrb[9].mxu0  ;;  %1021 = vmatmul.mubr.bf16.gmra.mrb[28].mxu1 %v339_v60  ;;  %v282_v13 = vadd.f32 %v1335_v29, %v281_v12  ;;  %v986_v14 = vpop.f32.mrb[9].mxu1 }
  0xfd   :  { %v228_v5 = vpop.f32.mrb[10].mxu0  ;;  %1024 = vmatprep.mubr.msk.bf16.mxu1 %vm1201_vm0, %v1200_v0  ;;  %v284_v16 = vpop.f32.mrb[10].mxu1 }
  0xfe   :  { %v229_v7 = vadd.f32 %v1335_v29, %v228_v5  ;;  %v959_v8 = vpop.f32.mrb[11].mxu0  ;;  %v316_v10 = vmax.f32 %v226_v3, 0.0  ;;  %v330_v18 = vmax.f32 %v282_v13, 0.0  ;;  %v285_v19 = vadd.f32 %v1335_v29, %v284_v16  ;;  %v987_v20 = vpop.f32.mrb[11].mxu1 }
 0x100   :  { %v317_v11 = vmax.f32 %v229_v7, 0.0  ;;  %v331_v24 = vmax.f32 %v285_v19, 0.0 }
 0x102   :  { %v340_v15 = vpack.c.bf16 %v317_v11, %v316_v10  ;;  %v1363_v27 = vpack.c.bf16 %v331_v24, %v330_v18 }
 0x103   :  { %v233_v17 = vpop.f32.mrb[12].mxu0  ;;  %v289_v31 = vpop.f32.mrb[12].mxu1 }
 0x104   :  { %v234_v21 = vadd.f32 %v1335_v29, %v233_v17  ;;  %v962_v22 = vpop.f32.mrb[13].mxu0  ;;  %1025 = vmatmul.mubr.bf16.gmra.mrb[32].mxu1 %v340_v15  ;;  %v290_v32 = vadd.f32 %v1335_v29, %v289_v31  ;;  %v990_v33 = vpop.f32.mrb[13].mxu1 }
 0x105   :  { %v236_v23 = vpop.f32.mrb[14].mxu0  ;;  %1028 = vmatprep.mubr.msk.bf16.mxu1 %vm1201_vm0, %v1200_v0  ;;  %v292_v35 = vpop.f32.mrb[14].mxu1 }
 0x106   :  { %v237_v25 = vadd.f32 %v1335_v29, %v236_v23  ;;  %v963_v26 = vpop.f32.mrb[15].mxu0  ;;  %v318_v28 = vmax.f32 %v234_v21, 0.0  ;;  %v332_v37 = vmax.f32 %v290_v32, 0.0  ;;  %v293_v38 = vadd.f32 %v1335_v29, %v292_v35  ;;  %v991_v39 = vpop.f32.mrb[15].mxu1 }
 0x108   :  { %v319_v30 = vmax.f32 %v237_v25, 0.0  ;;  %v333_v43 = vmax.f32 %v293_v38, 0.0 }
 0x10a   :  { %v341_v34 = vpack.c.bf16 %v319_v30, %v318_v28  ;;  %v348_v46 = vpack.c.bf16 %v333_v43, %v332_v37 }
 0x10b   :  { %v241_v36 = vpop.f32.mrb[16].mxu0  ;;  %v297_v49 = vpop.f32.mrb[16].mxu1 }
 0x10c   :  { %v242_v40 = vadd.f32 %v1335_v29, %v241_v36  ;;  %v966_v41 = vpop.f32.mrb[17].mxu0  ;;  %1029 = vmatmul.mubr.bf16.gmra.mrb[36].mxu1 %v341_v34  ;;  %v298_v50 = vadd.f32 %v1335_v29, %v297_v49  ;;  %v994_v51 = vpop.f32.mrb[17].mxu1 }
 0x10d   :  { %v244_v42 = vpop.f32.mrb[18].mxu0  ;;  %1032 = vmatprep.mubr.msk.bf16.mxu1 %vm1201_vm0, %v1200_v0  ;;  %v300_v53 = vpop.f32.mrb[18].mxu1 }
 0x10e   :  { %v245_v44 = vadd.f32 %v1335_v29, %v244_v42  ;;  %v967_v45 = vpop.f32.mrb[19].mxu0  ;;  %v320_v47 = vmax.f32 %v242_v40, 0.0  ;;  %v334_v56 = vmax.f32 %v298_v50, 0.0  ;;  %v301_v57 = vadd.f32 %v1335_v29, %v300_v53  ;;  %v995_v58 = vpop.f32.mrb[19].mxu1 }
 0x110   :  { %v321_v48 = vmax.f32 %v245_v44, 0.0  ;;  %v335_v62 = vmax.f32 %v301_v57, 0.0 }
 0x112   :  { %v342_v52 = vpack.c.bf16 %v321_v48, %v320_v47  ;;  %v349_v2 = vpack.c.bf16 %v335_v62, %v334_v56 }
 0x113   :  { %v249_v55 = vpop.f32.mrb[20].mxu0  ;;  %v305_v5 = vpop.f32.mrb[20].mxu1 }
 0x114   :  { %v250_v59 = vadd.f32 %v1335_v29, %v249_v55  ;;  %v970_v60 = vpop.f32.mrb[21].mxu0  ;;  %1033 = vmatmul.mubr.bf16.gmra.mrb[40].mxu1 %v342_v52  ;;  %v306_v6 = vadd.f32 %v1335_v29, %v305_v5  ;;  %v998_v7 = vpop.f32.mrb[21].mxu1 }
 0x115   :  { %v252_v61 = vpop.f32.mrb[22].mxu0  ;;  %1036 = vmatprep.mubr.msk.bf16.mxu1 %vm1201_vm0, %v1200_v0  ;;  %v308_v10 = vpop.f32.mrb[22].mxu1 }
 0x116   :  { %v253_v63 = vadd.f32 %v1335_v29, %v252_v61  ;;  %v971_v1 = vpop.f32.mrb[23].mxu0  ;;  %v322_v3 = vmax.f32 %v250_v59, 0.0  ;;  %v336_v12 = vmax.f32 %v306_v6, 0.0  ;;  %v309_v13 = vadd.f32 %v1335_v29, %v308_v10  ;;  %v999_v14 = vpop.f32.mrb[23].mxu1 }
 0x118   :  { %v323_v4 = vmax.f32 %v253_v63, 0.0  ;;  %v337_v18 = vmax.f32 %v309_v13, 0.0 }
 0x11a   :  { %v343_v8 = vpack.c.bf16 %v323_v4, %v322_v3  ;;  %v350_v21 = vpack.c.bf16 %v337_v18, %v336_v12 }
 0x11b   :  { %v257_v11 = vpop.f32.mrb[24].mxu0 }
 0x11c   :  { %v258_v15 = vadd.f32 %v1335_v29, %v257_v11  ;;  %v974_v16 = vpop.f32.mrb[25].mxu0  ;;  %1037 = vmatmul.mubr.bf16.gmra.mrb[44].mxu1 %v343_v8 }
 0x11d   :  { %v260_v17 = vpop.f32.mrb[26].mxu0  ;;  %1040 = vmatprep.mubr.msk.bf16.mxu1 %vm1201_vm0, %v1200_v0 }
 0x11e   :  { %v261_v19 = vadd.f32 %v1335_v29, %v260_v17  ;;  %v975_v20 = vpop.f32.mrb[27].mxu0  ;;  %v324_v22 = vmax.f32 %v258_v15, 0.0  ;;  %v1172_v29 = vld [vmem:[#allocation2 + $0xb8] sm:$0xff]  }
 0x11f   :  { %1083 = vmatpush3.bf16.msra.mxu0 %v1172_v29 }
 0x120   :  { %v325_v23 = vmax.f32 %v261_v19, 0.0 }
 0x122   :  { %v344_v24 = vpack.c.bf16 %v325_v23, %v324_v22 }
 0x124   :  { %1041 = vmatmul.mubr.bf16.gmra.mrb[48].mxu1 %v344_v24 }
 0x125   :  { %1044 = vmatprep.mubr.msk.bf16.mxu1 %vm1201_vm0, %v1200_v0 }
 0x12c   :  { %1045 = vmatmul.mubr.bf16.gmra.mrb[52].mxu1 %v1347_v54  ;;  %v1401_v54 = vld [vmem:[%s1590_s2 + $0x1] ss:$0 sm:$0xff] }
 0x12d   :  { %1048 = vmatprep.mubr.msk.bf16.mxu1 %vm1201_vm0, %v1200_v0 }
 0x134   :  { %1049 = vmatmul.mubr.bf16.gmra.mrb[56].mxu1 %v1355_v9 }
 0x135   :  { %1052 = vmatprep.mubr.msk.bf16.mxu1 %vm1201_vm0, %v1200_v0 }
 0x13c   :  { %1053 = vmatmul.mubr.bf16.gmra.mrb[60].mxu1 %v1363_v27 }
 0x13d   :  { %1056 = vmatprep.mubr.msk.bf16.mxu1 %vm1201_vm0, %v1200_v0 }
 0x144   :  { %1057 = vmatmul.mubr.bf16.gmra.mrb[64].mxu1 %v348_v46 }
 0x145   :  { %1060 = vmatprep.mubr.msk.bf16.mxu1 %vm1201_vm0, %v1200_v0 }
 0x14c   :  { %1061 = vmatmul.mubr.bf16.gmra.mrb[68].mxu1 %v349_v2 }
 0x14d   :  { %1064 = vmatprep.mubr.msk.bf16.mxu1 %vm1201_vm0, %v1200_v0 }
 0x154   :  { %1065 = vmatmul.mubr.bf16.gmra.mrb[72].mxu1 %v350_v21 }
 0x1c7   :  { %v458_v9 = vpop.f32.mrb[24].mxu1 }
 0x1c8   :  { %v459_v25 = vadd.f32 %v1401_v54, %v458_v9  ;;  %v1018_v26 = vpop.f32.mrb[25].mxu1 }
 0x1c9   :  { %v461_v27 = vpop.f32.mrb[26].mxu1 }
 0x1ca   :  { %v462_v28 = vadd.f32 %v1401_v54, %v461_v27  ;;  %v1019_v30 = vpop.f32.mrb[27].mxu1  ;;  %v561_v31 = vmax.f32 %v459_v25, 0.0 }
 0x1cc   :  { %v562_v32 = vmax.f32 %v462_v28, 0.0 }
 0x1ce   :  { %v587_v33 = vpack.c.bf16 %v562_v32, %v561_v31 }
 0x1cf   :  { %v466_v34 = vpop.f32.mrb[28].mxu1 }
 0x1d0   :  { %v467_v35 = vadd.f32 %v1401_v54, %v466_v34  ;;  %v1022_v36 = vpop.f32.mrb[29].mxu1  ;;  %1085 = vmatmul.mubr.bf16.vlgmr.msra.gmra.mrb[28].mxu0 %v587_v33 }
 0x1d1   :  { %v469_v37 = vpop.f32.mrb[30].mxu1  ;;  %1088 = vmatprep.mubr.msk.bf16.mxu0 %vm1201_vm0, %v1200_v0 }
 0x1d2   :  { %v470_v38 = vadd.f32 %v1401_v54, %v469_v37  ;;  %v1023_v39 = vpop.f32.mrb[31].mxu1  ;;  %v563_v40 = vmax.f32 %v467_v35, 0.0 }
 0x1d4   :  { %v564_v41 = vmax.f32 %v470_v38, 0.0 }
 0x1d6   :  { %v588_v42 = vpack.c.bf16 %v564_v41, %v563_v40 }
 0x1d7   :  { %v474_v43 = vpop.f32.mrb[32].mxu1 }
 0x1d8   :  { %v475_v44 = vadd.f32 %v1401_v54, %v474_v43  ;;  %v1026_v45 = vpop.f32.mrb[33].mxu1  ;;  %1089 = vmatmul.mubr.bf16.gmra.mrb[32].mxu0 %v588_v42 }
 0x1d9   :  { %v477_v46 = vpop.f32.mrb[34].mxu1  ;;  %1092 = vmatprep.mubr.msk.bf16.mxu0 %vm1201_vm0, %v1200_v0 }
 0x1da   :  { %v478_v47 = vadd.f32 %v1401_v54, %v477_v46  ;;  %v1027_v48 = vpop.f32.mrb[35].mxu1  ;;  %v565_v49 = vmax.f32 %v475_v44, 0.0 }
 0x1dc   :  { %v566_v50 = vmax.f32 %v478_v47, 0.0 }
 0x1de   :  { %v589_v51 = vpack.c.bf16 %v566_v50, %v565_v49 }
 0x1df   :  { %v482_v52 = vpop.f32.mrb[36].mxu1 }
 0x1e0   :  { %v483_v53 = vadd.f32 %v1401_v54, %v482_v52  ;;  %v1030_v55 = vpop.f32.mrb[37].mxu1  ;;  %1093 = vmatmul.mubr.bf16.gmra.mrb[36].mxu0 %v589_v51 }
 0x1e1   :  { %v485_v56 = vpop.f32.mrb[38].mxu1  ;;  %1096 = vmatprep.mubr.msk.bf16.mxu0 %vm1201_vm0, %v1200_v0 }
 0x1e2   :  { %v486_v57 = vadd.f32 %v1401_v54, %v485_v56  ;;  %v1031_v58 = vpop.f32.mrb[39].mxu1  ;;  %v567_v59 = vmax.f32 %v483_v53, 0.0 }
 0x1e4   :  { %v568_v60 = vmax.f32 %v486_v57, 0.0 }
 0x1e6   :  { %v590_v61 = vpack.c.bf16 %v568_v60, %v567_v59 }
 0x1e7   :  { %v490_v62 = vpop.f32.mrb[40].mxu1 }
 0x1e8   :  { %v491_v63 = vadd.f32 %v1401_v54, %v490_v62  ;;  %v1034_v1 = vpop.f32.mrb[41].mxu1  ;;  %1097 = vmatmul.mubr.bf16.gmra.mrb[40].mxu0 %v590_v61 }
 0x1e9   :  { %v493_v2 = vpop.f32.mrb[42].mxu1  ;;  %1100 = vmatprep.mubr.msk.bf16.mxu0 %vm1201_vm0, %v1200_v0 }
 0x1ea   :  { %v494_v3 = vadd.f32 %v1401_v54, %v493_v2  ;;  %v1035_v4 = vpop.f32.mrb[43].mxu1  ;;  %v569_v5 = vmax.f32 %v491_v63, 0.0 }
 0x1ec   :  { %v570_v6 = vmax.f32 %v494_v3, 0.0 }
 0x1ee   :  { %v591_v7 = vpack.c.bf16 %v570_v6, %v569_v5 }
 0x1ef   :  { %v498_v8 = vpop.f32.mrb[44].mxu1 }
 0x1f0   :  { %v499_v10 = vadd.f32 %v1401_v54, %v498_v8  ;;  %v1038_v11 = vpop.f32.mrb[45].mxu1  ;;  %1101 = vmatmul.mubr.bf16.gmra.mrb[44].mxu0 %v591_v7 }
 0x1f1   :  { %v501_v12 = vpop.f32.mrb[46].mxu1  ;;  %1104 = vmatprep.mubr.msk.bf16.mxu0 %vm1201_vm0, %v1200_v0 }
 0x1f2   :  { %v502_v13 = vadd.f32 %v1401_v54, %v501_v12  ;;  %v1039_v14 = vpop.f32.mrb[47].mxu1  ;;  %v571_v15 = vmax.f32 %v499_v10, 0.0 }
 0x1f4   :  { %v572_v16 = vmax.f32 %v502_v13, 0.0 }
 0x1f6   :  { %v592_v17 = vpack.c.bf16 %v572_v16, %v571_v15 }
 0x1f7   :  { %v506_v18 = vpop.f32.mrb[48].mxu1 }
 0x1f8   :  { %v507_v19 = vadd.f32 %v1401_v54, %v506_v18  ;;  %v1042_v20 = vpop.f32.mrb[49].mxu1  ;;  %1105 = vmatmul.mubr.bf16.gmra.mrb[48].mxu0 %v592_v17 }
 0x1f9   :  { %v509_v21 = vpop.f32.mrb[50].mxu1  ;;  %1108 = vmatprep.mubr.msk.bf16.mxu0 %vm1201_vm0, %v1200_v0 }
 0x1fa   :  { %v510_v22 = vadd.f32 %v1401_v54, %v509_v21  ;;  %v1043_v23 = vpop.f32.mrb[51].mxu1  ;;  %v573_v24 = vmax.f32 %v507_v19, 0.0  ;;  %v1456_v19 = vld [vmem:[%s1590_s2 + $0x2] ss:$0 sm:$0xff] }
 0x1fc   :  { %v574_v29 = vmax.f32 %v510_v22, 0.0 }
 0x1fe   :  { %v593_v9 = vpack.c.bf16 %v574_v29, %v573_v24 }
 0x1ff   :  { %v514_v25 = vpop.f32.mrb[52].mxu1 }
 0x200   :  { %v515_v26 = vadd.f32 %v1401_v54, %v514_v25  ;;  %v1046_v27 = vpop.f32.mrb[53].mxu1  ;;  %1109 = vmatmul.mubr.bf16.gmra.mrb[52].mxu0 %v593_v9 }
 0x201   :  { %v517_v28 = vpop.f32.mrb[54].mxu1  ;;  %1112 = vmatprep.mubr.msk.bf16.mxu0 %vm1201_vm0, %v1200_v0 }
 0x202   :  { %v518_v30 = vadd.f32 %v1401_v54, %v517_v28  ;;  %v1047_v31 = vpop.f32.mrb[55].mxu1  ;;  %v575_v32 = vmax.f32 %v515_v26, 0.0 }
 0x204   :  { %v576_v33 = vmax.f32 %v518_v30, 0.0 }
 0x206   :  { %v594_v34 = vpack.c.bf16 %v576_v33, %v575_v32 }
 0x207   :  { %v522_v35 = vpop.f32.mrb[56].mxu1 }
 0x208   :  { %v523_v36 = vadd.f32 %v1401_v54, %v522_v35  ;;  %v1050_v37 = vpop.f32.mrb[57].mxu1  ;;  %1113 = vmatmul.mubr.bf16.gmra.mrb[56].mxu0 %v594_v34 }
 0x209   :  { %v525_v38 = vpop.f32.mrb[58].mxu1  ;;  %1116 = vmatprep.mubr.msk.bf16.mxu0 %vm1201_vm0, %v1200_v0 }
 0x20a   :  { %v526_v39 = vadd.f32 %v1401_v54, %v525_v38  ;;  %v1051_v40 = vpop.f32.mrb[59].mxu1  ;;  %v577_v41 = vmax.f32 %v523_v36, 0.0 }
 0x20c   :  { %v578_v42 = vmax.f32 %v526_v39, 0.0 }
 0x20e   :  { %v595_v43 = vpack.c.bf16 %v578_v42, %v577_v41 }
 0x20f   :  { %v530_v44 = vpop.f32.mrb[60].mxu1 }
 0x210   :  { %v531_v45 = vadd.f32 %v1401_v54, %v530_v44  ;;  %v1054_v46 = vpop.f32.mrb[61].mxu1  ;;  %1117 = vmatmul.mubr.bf16.gmra.mrb[60].mxu0 %v595_v43 }
 0x211   :  { %v533_v47 = vpop.f32.mrb[62].mxu1  ;;  %1120 = vmatprep.mubr.msk.bf16.mxu0 %vm1201_vm0, %v1200_v0 }
 0x212   :  { %v534_v48 = vadd.f32 %v1401_v54, %v533_v47  ;;  %v1055_v49 = vpop.f32.mrb[63].mxu1  ;;  %v579_v50 = vmax.f32 %v531_v45, 0.0 }
 0x214   :  { %v580_v51 = vmax.f32 %v534_v48, 0.0 }
 0x216   :  { %v596_v52 = vpack.c.bf16 %v580_v51, %v579_v50 }
 0x217   :  { %v538_v53 = vpop.f32.mrb[64].mxu1 }
 0x218   :  { %v539_v55 = vadd.f32 %v1401_v54, %v538_v53  ;;  %v1058_v56 = vpop.f32.mrb[65].mxu1  ;;  %1121 = vmatmul.mubr.bf16.gmra.mrb[64].mxu0 %v596_v52 }
 0x219   :  { %v541_v57 = vpop.f32.mrb[66].mxu1  ;;  %1124 = vmatprep.mubr.msk.bf16.mxu0 %vm1201_vm0, %v1200_v0 }
 0x21a   :  { %v542_v58 = vadd.f32 %v1401_v54, %v541_v57  ;;  %v1059_v59 = vpop.f32.mrb[67].mxu1  ;;  %v581_v60 = vmax.f32 %v539_v55, 0.0 }
 0x21c   :  { %v582_v61 = vmax.f32 %v542_v58, 0.0 }
 0x21e   :  { %v597_v62 = vpack.c.bf16 %v582_v61, %v581_v60 }
 0x21f   :  { %v546_v63 = vpop.f32.mrb[68].mxu1 }
 0x220   :  { %v547_v1 = vadd.f32 %v1401_v54, %v546_v63  ;;  %v1062_v2 = vpop.f32.mrb[69].mxu1  ;;  %1125 = vmatmul.mubr.bf16.gmra.mrb[68].mxu0 %v597_v62 }
 0x221   :  { %v549_v3 = vpop.f32.mrb[70].mxu1  ;;  %1128 = vmatprep.mubr.msk.bf16.mxu0 %vm1201_vm0, %v1200_v0 }
 0x222   :  { %v550_v4 = vadd.f32 %v1401_v54, %v549_v3  ;;  %v1063_v5 = vpop.f32.mrb[71].mxu1  ;;  %v583_v6 = vmax.f32 %v547_v1, 0.0 }
 0x224   :  { %v584_v7 = vmax.f32 %v550_v4, 0.0 }
 0x226   :  { %v598_v8 = vpack.c.bf16 %v584_v7, %v583_v6 }
 0x227   :  { %v554_v10 = vpop.f32.mrb[72].mxu1 }
 0x228   :  { %v555_v11 = vadd.f32 %v1401_v54, %v554_v10  ;;  %v1066_v12 = vpop.f32.mrb[73].mxu1  ;;  %1129 = vmatmul.mubr.bf16.gmra.mrb[72].mxu0 %v598_v8 }
 0x229   :  { %v557_v13 = vpop.f32.mrb[74].mxu1  ;;  %1132 = vmatprep.mubr.msk.bf16.mxu0 %vm1201_vm0, %v1200_v0 }
 0x22a   :  { %v558_v14 = vadd.f32 %v1401_v54, %v557_v13  ;;  %v1067_v15 = vpop.f32.mrb[75].mxu1  ;;  %v585_v16 = vmax.f32 %v555_v11, 0.0 }
 0x22c   :  { %v586_v17 = vmax.f32 %v558_v14, 0.0 }
 0x22e   :  { %v599_v18 = vpack.c.bf16 %v586_v17, %v585_v16 }
 0x230   :  { %1133 = vmatmul.mubr.bf16.gmra.mrb[76].mxu0 %v599_v18 }
 0x2a3   :  { %v707_v20 = vpop.f32.mrb[28].mxu0 }
 0x2a4   :  { %v708_v21 = vadd.f32 %v1456_v19, %v707_v20  ;;  %v1086_v22 = vpop.f32.mrb[29].mxu0 }
 0x2a5   :  { %v710_v23 = vpop.f32.mrb[30].mxu0 }
 0x2a6   :  { %811 = vst.msk [vmem:[%s1591_s3] sm:$0xff] %vm810_vm2, %v708_v21  ;;  %v711_v0 = vadd.f32 %v1456_v19, %v710_v23  ;;  %v1087_v54 = vpop.f32.mrb[31].mxu0 }
 0x2a8   :  { %812 = vst.msk [vmem:[%s1591_s3 + $0x8] sm:$0xff] %vm810_vm2, %v711_v0 }
 0x2ab   :  { %v715_v24 = vpop.f32.mrb[32].mxu0 }
 0x2ac   :  { %v716_v29 = vadd.f32 %v1456_v19, %v715_v24  ;;  %v1090_v9 = vpop.f32.mrb[33].mxu0 }
 0x2ad   :  { %v718_v25 = vpop.f32.mrb[34].mxu0 }
 0x2ae   :  { %813 = vst.msk [vmem:[%s1591_s3 + $0x10] sm:$0xff] %vm810_vm2, %v716_v29  ;;  %v719_v26 = vadd.f32 %v1456_v19, %v718_v25  ;;  %v1091_v27 = vpop.f32.mrb[35].mxu0 }
 0x2b0   :  { %814 = vst.msk [vmem:[%s1591_s3 + $0x18] sm:$0xff] %vm810_vm2, %v719_v26 }
 0x2b3   :  { %v723_v28 = vpop.f32.mrb[36].mxu0 }
 0x2b4   :  { %v724_v30 = vadd.f32 %v1456_v19, %v723_v28  ;;  %v1094_v31 = vpop.f32.mrb[37].mxu0 }
 0x2b5   :  { %v726_v32 = vpop.f32.mrb[38].mxu0 }
 0x2b6   :  { %815 = vst.msk [vmem:[%s1591_s3 + $0x20] sm:$0xff] %vm810_vm2, %v724_v30  ;;  %v727_v33 = vadd.f32 %v1456_v19, %v726_v32  ;;  %v1095_v34 = vpop.f32.mrb[39].mxu0 }
 0x2b8   :  { %816 = vst.msk [vmem:[%s1591_s3 + $0x28] sm:$0xff] %vm810_vm2, %v727_v33 }
 0x2bb   :  { %v731_v35 = vpop.f32.mrb[40].mxu0 }
 0x2bc   :  { %v732_v36 = vadd.f32 %v1456_v19, %v731_v35  ;;  %v1098_v37 = vpop.f32.mrb[41].mxu0 }
 0x2bd   :  { %v734_v38 = vpop.f32.mrb[42].mxu0 }
 0x2be   :  { %817 = vst.msk [vmem:[%s1591_s3 + $0x30] sm:$0xff] %vm810_vm2, %v732_v36  ;;  %v735_v39 = vadd.f32 %v1456_v19, %v734_v38  ;;  %v1099_v40 = vpop.f32.mrb[43].mxu0 }
 0x2c0   :  { %818 = vst.msk [vmem:[%s1591_s3 + $0x38] sm:$0xff] %vm810_vm2, %v735_v39 }
 0x2c3   :  { %v739_v41 = vpop.f32.mrb[44].mxu0 }
 0x2c4   :  { %v740_v42 = vadd.f32 %v1456_v19, %v739_v41  ;;  %v1102_v43 = vpop.f32.mrb[45].mxu0 }
 0x2c5   :  { %v742_v44 = vpop.f32.mrb[46].mxu0 }
 0x2c6   :  { %819 = vst.msk [vmem:[%s1591_s3 + $0x40] sm:$0xff] %vm810_vm2, %v740_v42  ;;  %v743_v45 = vadd.f32 %v1456_v19, %v742_v44  ;;  %v1103_v46 = vpop.f32.mrb[47].mxu0 }
 0x2c8   :  { %820 = vst.msk [vmem:[%s1591_s3 + $0x48] sm:$0xff] %vm810_vm2, %v743_v45 }
 0x2cb   :  { %v747_v47 = vpop.f32.mrb[48].mxu0 }
 0x2cc   :  { %v748_v48 = vadd.f32 %v1456_v19, %v747_v47  ;;  %v1106_v49 = vpop.f32.mrb[49].mxu0 }
 0x2cd   :  { %v750_v50 = vpop.f32.mrb[50].mxu0 }
 0x2ce   :  { %821 = vst.msk [vmem:[%s1591_s3 + $0x50] sm:$0xff] %vm810_vm2, %v748_v48  ;;  %v751_v51 = vadd.f32 %v1456_v19, %v750_v50  ;;  %v1107_v52 = vpop.f32.mrb[51].mxu0 }
 0x2d0   :  { %822 = vst.msk [vmem:[%s1591_s3 + $0x58] sm:$0xff] %vm810_vm2, %v751_v51 }
 0x2d3   :  { %v755_v53 = vpop.f32.mrb[52].mxu0 }
 0x2d4   :  { %v756_v55 = vadd.f32 %v1456_v19, %v755_v53  ;;  %v1110_v56 = vpop.f32.mrb[53].mxu0 }
 0x2d5   :  { %v758_v57 = vpop.f32.mrb[54].mxu0 }
 0x2d6   :  { %823 = vst.msk [vmem:[%s1591_s3 + $0x60] sm:$0xff] %vm810_vm2, %v756_v55  ;;  %v759_v58 = vadd.f32 %v1456_v19, %v758_v57  ;;  %v1111_v59 = vpop.f32.mrb[55].mxu0 }
 0x2d8   :  { %824 = vst.msk [vmem:[%s1591_s3 + $0x68] sm:$0xff] %vm810_vm2, %v759_v58 }
 0x2db   :  { %v763_v60 = vpop.f32.mrb[56].mxu0 }
 0x2dc   :  { %v764_v61 = vadd.f32 %v1456_v19, %v763_v60  ;;  %v1114_v62 = vpop.f32.mrb[57].mxu0 }
 0x2dd   :  { %v766_v63 = vpop.f32.mrb[58].mxu0 }
 0x2de   :  { %825 = vst.msk [vmem:[%s1591_s3 + $0x70] sm:$0xff] %vm810_vm2, %v764_v61  ;;  %v767_v1 = vadd.f32 %v1456_v19, %v766_v63  ;;  %v1115_v2 = vpop.f32.mrb[59].mxu0 }
 0x2e0   :  { %826 = vst.msk [vmem:[%s1591_s3 + $0x78] sm:$0xff] %vm810_vm2, %v767_v1 }
 0x2e3   :  { %v771_v3 = vpop.f32.mrb[60].mxu0 }
 0x2e4   :  { %v772_v4 = vadd.f32 %v1456_v19, %v771_v3  ;;  %v1118_v5 = vpop.f32.mrb[61].mxu0 }
 0x2e5   :  { %v774_v6 = vpop.f32.mrb[62].mxu0 }
 0x2e6   :  { %827 = vst.msk [vmem:[%s1591_s3 + $0x80] sm:$0xff] %vm810_vm2, %v772_v4  ;;  %v775_v7 = vadd.f32 %v1456_v19, %v774_v6  ;;  %v1119_v8 = vpop.f32.mrb[63].mxu0 }
 0x2e8   :  { %828 = vst.msk [vmem:[%s1591_s3 + $0x88] sm:$0xff] %vm810_vm2, %v775_v7 }
 0x2eb   :  { %v779_v10 = vpop.f32.mrb[64].mxu0 }
 0x2ec   :  { %v780_v11 = vadd.f32 %v1456_v19, %v779_v10  ;;  %v1122_v12 = vpop.f32.mrb[65].mxu0 }
 0x2ed   :  { %v782_v13 = vpop.f32.mrb[66].mxu0 }
 0x2ee   :  { %829 = vst.msk [vmem:[%s1591_s3 + $0x90] sm:$0xff] %vm810_vm2, %v780_v11  ;;  %v783_v14 = vadd.f32 %v1456_v19, %v782_v13  ;;  %v1123_v15 = vpop.f32.mrb[67].mxu0 }
 0x2f0   :  { %830 = vst.msk [vmem:[%s1591_s3 + $0x98] sm:$0xff] %vm810_vm2, %v783_v14 }
 0x2f3   :  { %v787_v16 = vpop.f32.mrb[68].mxu0 }
 0x2f4   :  { %v788_v17 = vadd.f32 %v1456_v19, %v787_v16  ;;  %v1126_v18 = vpop.f32.mrb[69].mxu0 }
 0x2f5   :  { %v790_v20 = vpop.f32.mrb[70].mxu0 }
 0x2f6   :  { %831 = vst.msk [vmem:[%s1591_s3 + $0xa0] sm:$0xff] %vm810_vm2, %v788_v17  ;;  %v791_v21 = vadd.f32 %v1456_v19, %v790_v20  ;;  %v1127_v22 = vpop.f32.mrb[71].mxu0 }
 0x2f8   :  { %832 = vst.msk [vmem:[%s1591_s3 + $0xa8] sm:$0xff] %vm810_vm2, %v791_v21 }
 0x2fb   :  { %v795_v23 = vpop.f32.mrb[72].mxu0 }
 0x2fc   :  { %v796_v0 = vadd.f32 %v1456_v19, %v795_v23  ;;  %v1130_v54 = vpop.f32.mrb[73].mxu0 }
 0x2fd   :  { %v798_v24 = vpop.f32.mrb[74].mxu0 }
 0x2fe   :  { %833 = vst.msk [vmem:[%s1591_s3 + $0xb0] sm:$0xff] %vm810_vm2, %v796_v0  ;;  %v799_v29 = vadd.f32 %v1456_v19, %v798_v24  ;;  %v1131_v9 = vpop.f32.mrb[75].mxu0 }
 0x300   :  { %834 = vst.msk [vmem:[%s1591_s3 + $0xb8] sm:$0xff] %vm810_vm2, %v799_v29 }
 0x303   :  { %v803_v25 = vpop.f32.mrb[76].mxu0 }
 0x304   :  { %v804_v26 = vadd.f32 %v1456_v19, %v803_v25  ;;  %v1134_v27 = vpop.f32.mrb[77].mxu0 }
 0x305   :  { %v806_v28 = vpop.f32.mrb[78].mxu0 }
 0x306   :  { %835 = vst.msk [vmem:[%s1591_s3 + $0xc0] sm:$0xff] %vm810_vm2, %v804_v26  ;;  %v807_v30 = vadd.f32 %v1456_v19, %v806_v28  ;;  %v1135_v31 = vpop.f32.mrb[79].mxu0 }
 0x308   :  { %836 = vst.msk [vmem:[%s1591_s3 + $0xc8] sm:$0xff] %vm810_vm2, %v807_v30 }
 0x309   :  { %841 = vsyncpa [#allocation3], 1 }

</bundles_post_ra>
